<compile_context>
chip_gen: v7x
topology: tpu7x:2x2x1
jax: 0.10.0
libtpu: 0.0.40
codegen_flags: <defaults>
</compile_context>

<pallas_src>
from math import pi as PI

import jax
import jax.numpy as jnp
from jax.experimental import pallas as pl
from jax.experimental.pallas import tpu as pltpu


def _int_pow(x, k):
    """x ** k for static integer k >= 1 via square-and-multiply (VALU only)."""
    result = None
    base = x
    while k > 0:
        if k & 1:
            result = base if result is None else result * base
        k >>= 1
        if k:
            base = base * base
    return result


def _bessel_basis_kernel(dist_ref, freq_ref, out_ref, *, n, tile_n, cutoff, p, a, b, c):
    # dist_ref: (1, tile_n), freq_ref: (num_radial, 1), out_ref: (num_radial, tile_n)
    i = pl.program_id(0)

    # In-kernel ragged-tile handling (replaces a wrapper-side jnp.pad of dist):
    # lanes beyond N get dist = cutoff -> x = 1 -> env = 0, so they contribute
    # nothing; their output columns are out of bounds and dropped on writeback.
    lane = jax.lax.broadcasted_iota(jnp.int32, (1, tile_n), 1)
    valid = (lane + i * tile_n) < n
    d = jnp.where(valid, dist_ref[...], cutoff)

    x = d * (1.0 / cutoff)                                # (1, tile_n)

    # 1/x on the EUP (approx) + one Newton-Raphson step -> ~2^-24 rel. error,
    # so the 1e-5 check against the exact-divide reference still passes.
    # Note: dist == 0 still yields inf/NaN, matching the PyTorch reference.
    r = pl.reciprocal(x, approx=True)
    inv_x = r * (2.0 - x * r)

    # Envelope in Horner form, evaluated once per edge on the (1, tile_n) row:
    #   env = (1/x + x^(p-1) * (a + x*(b + c*x))) * (x < 1)
    mask = (x < 1.0).astype(x.dtype)
    x_pm1 = _int_pow(x, p - 1)
    env = (inv_x + x_pm1 * (a + x * (b + c * x))) * mask  # (1, tile_n)

    freq = freq_ref[...]                                  # (num_radial, 1), resident
    # (num_radial, 1) * (1, tile_n) -> (num_radial, tile_n), lane-dense store.
    out_ref[...] = (env * jnp.sin(freq * x)).astype(out_ref.dtype)


def bessel_basis_layer_t(dist, freq, *, cutoff=5.0, envelope_exponent=5,
                         max_tile_n=32768):
    """dist: (N,) f32; freq: (num_radial,) f32 -> lane-dense (num_radial, N)."""
    n = dist.shape[0]
    num_radial = freq.shape[0]

    p = envelope_exponent + 1
    a = -(p + 1) * (p + 2) / 2.0
    b = p * (p + 2) * 1.0
    c = -p * (p + 1) / 2.0

    # Tile choice: big lane-dense tiles (multiple of 128) so per-grid-step
    # overhead is amortized, but aim for >= 2 grid steps when N allows so the
    # "parallel" axis can be split across v7x's two TensorCores.
    n128 = pl.cdiv(n, 128) * 128
    half_aligned = pl.cdiv(pl.cdiv(n128, 2), 128) * 128
    tile_n = max(128, min(max_tile_n, half_aligned))
    grid = pl.cdiv(n, tile_n)

    dist_row = dist.reshape(1, n)             # lane-dense row, no padding copy
    freq_col = freq.reshape(num_radial, 1)

    kernel = lambda d, f, o: _bessel_basis_kernel(
        d, f, o, n=n, tile_n=tile_n, cutoff=cutoff, p=p, a=a, b=b, c=c
    )

    cost = pl.CostEstimate(
        # per edge: ~16 VALU ops (mask/where/Horner/powers/Newton) on the row,
        # per (edge, radial): freq*x mul + env mul.
        flops=n * 16 + n * num_radial * 2,
        # sin per (edge, radial) + approx reciprocal per edge.
        transcendentals=n * num_radial + n,
        bytes_accessed=4 * n + 4 * num_radial + 4 * n * num_radial,
    )

    return pl.pallas_call(
        kernel,
        out_shape=jax.ShapeDtypeStruct((num_radial, n), dist.dtype),
        grid_spec=pl.GridSpec(
            grid=(grid,),
            in_specs=[
                pl.BlockSpec((1, tile_n), lambda i: (0, i)),
                pl.BlockSpec((num_radial, 1), lambda i: (0, 0)),
            ],
            out_specs=pl.BlockSpec((num_radial, tile_n), lambda i: (0, i)),
        ),
        compiler_params=pltpu.CompilerParams(dimension_semantics=("parallel",)),
        cost_estimate=cost,
    )(dist_row, freq_col)


def bessel_basis_layer(dist, freq, *, cutoff=5.0, envelope_exponent=5,
                       max_tile_n=32768):
    """Module-contract wrapper: returns (N, num_radial) like the PyTorch layer.

    TODO(synk): the downstream DimeNet dense layer should consume the
    lane-dense rbf^T from bessel_basis_layer_t and fold this transpose into
    its matmul; the explicit .T here re-streams the whole output through HBM.
    """
    out_t = bessel_basis_layer_t(
        dist, freq, cutoff=cutoff, envelope_exponent=envelope_exponent,
        max_tile_n=max_tile_n,
    )
    return out_t.T


def bessel_basis_ref(dist, freq, *, cutoff=5.0, envelope_exponent=5):
    """Pure-JAX reference mirroring the PyTorch forward."""
    p = envelope_exponent + 1
    a = -(p + 1) * (p + 2) / 2.0
    b = p * (p + 2) * 1.0
    c = -p * (p + 1) / 2.0
    x = dist[:, None] / cutoff
    x_pow_p0 = x ** (p - 1)
    x_pow_p1 = x_pow_p0 * x
    x_pow_p2 = x_pow_p1 * x
    env = (1.0 / x + a * x_pow_p0 + b * x_pow_p1 + c * x_pow_p2) * (x < 1.0).astype(x.dtype)
    return env * jnp.sin(freq[None, :] * x)


if __name__ == "__main__":
    num_radial = 8
    cutoff = 5.0
    envelope_exponent = 5
    n_edges = 64  # small demo shape; ragged tile handled in-kernel

    # Deterministic parameter init, matching reset_parameters():
    # freq = [1, 2, ..., num_radial] * pi
    freq = jnp.arange(1, num_radial + 1, dtype=jnp.float32) * PI

    # Deterministic example input: positive distances in (0, cutoff*1.2)
    key = jax.random.PRNGKey(0)
    dist = jax.random.uniform(
        key, (n_edges,), dtype=jnp.float32, minval=0.1, maxval=cutoff * 1.2
    )

    out = bessel_basis_layer(
        dist, freq, cutoff=cutoff, envelope_exponent=envelope_exponent
    )
    out = jax.block_until_ready(out)

    ref = bessel_basis_ref(dist, freq, cutoff=cutoff, envelope_exponent=envelope_exponent)
    assert out.shape == (n_edges, num_radial)
    assert jnp.allclose(out, ref, atol=1e-5, rtol=1e-5), "mismatch vs reference"

    print("KERNEL_OK")
</pallas_src>

<mosaic_0001>
module attributes {stable_mosaic.version = 11 : i64} {
  func.func @_lambda_(%arg0: i32, %arg1: memref<1x128xf32, #tpu.memory_space<vmem>>, %arg2: memref<8x1xf32, #tpu.memory_space<vmem>>, %arg3: memref<8x128xf32, #tpu.memory_space<vmem>>) attributes {dimension_semantics = [#tpu.dimension_semantics<parallel>], iteration_bounds = array<i64: 1>, scalar_prefetch = 0 : i64, scratch_operands = 0 : i64, tpu.core_type = #tpu.core_type<tc>, window_params = [{transform_indices = @transform_0, window_bounds = array<i64: 1, 128>}, {pipeline_mode = #tpu.pipeline_mode<synchronous>, transform_indices = @transform_1, window_bounds = array<i64: 8, 1>}, {transform_indices = @transform_2, window_bounds = array<i64: 8, 128>}]} {
    %0 = tpu.iota {dimensions = array<i32: 1>} : vector<1x128xi32>
    %c128_i32 = arith.constant 128 : i32
    %1 = arith.muli %arg0, %c128_i32 : i32
    %2 = vector.broadcast %1 : i32 to vector<1x128xi32>
    %3 = arith.addi %0, %2 : vector<1x128xi32>
    %c64_i32 = arith.constant 64 : i32
    %4 = vector.broadcast %c64_i32 : i32 to vector<1x128xi32>
    %5 = arith.cmpi slt, %3, %4 : vector<1x128xi32>
    %c0 = arith.constant 0 : index
    %c0_0 = arith.constant 0 : index
    %6 = vector.load %arg1[%c0, %c0_0] : memref<1x128xf32, #tpu.memory_space<vmem>>, vector<1x128xf32>
    %cst = arith.constant 5.000000e+00 : f32
    %7 = vector.broadcast %cst : f32 to vector<1x128xf32>
    %8 = arith.select %5, %6, %7 : vector<1x128xi1>, vector<1x128xf32>
    %cst_1 = arith.constant 2.000000e-01 : f32
    %9 = vector.broadcast %cst_1 : f32 to vector<1x128xf32>
    %10 = arith.mulf %8, %9 : vector<1x128xf32>
    %11 = tpu.reciprocal %10 {approx = true} : vector<1x128xf32> -> vector<1x128xf32>
    %12 = arith.mulf %10, %11 : vector<1x128xf32>
    %cst_2 = arith.constant 2.000000e+00 : f32
    %13 = vector.broadcast %cst_2 : f32 to vector<1x128xf32>
    %14 = arith.subf %13, %12 : vector<1x128xf32>
    %15 = arith.mulf %11, %14 : vector<1x128xf32>
    %cst_3 = arith.constant 1.000000e+00 : f32
    %16 = vector.broadcast %cst_3 : f32 to vector<1x128xf32>
    %17 = arith.cmpf olt, %10, %16 : vector<1x128xf32>
    %18 = arith.extui %17 : vector<1x128xi1> to vector<1x128xi32>
    %19 = arith.sitofp %18 : vector<1x128xi32> to vector<1x128xf32>
    %20 = arith.mulf %10, %10 : vector<1x128xf32>
    %21 = arith.mulf %20, %20 : vector<1x128xf32>
    %22 = arith.mulf %10, %21 : vector<1x128xf32>
    %cst_4 = arith.constant -2.100000e+01 : f32
    %23 = vector.broadcast %cst_4 : f32 to vector<1x128xf32>
    %24 = arith.mulf %23, %10 : vector<1x128xf32>
    %cst_5 = arith.constant 4.800000e+01 : f32
    %25 = vector.broadcast %cst_5 : f32 to vector<1x128xf32>
    %26 = arith.addf %25, %24 : vector<1x128xf32>
    %27 = arith.mulf %10, %26 : vector<1x128xf32>
    %cst_6 = arith.constant -2.800000e+01 : f32
    %28 = vector.broadcast %cst_6 : f32 to vector<1x128xf32>
    %29 = arith.addf %28, %27 : vector<1x128xf32>
    %30 = arith.mulf %22, %29 : vector<1x128xf32>
    %31 = arith.addf %15, %30 : vector<1x128xf32>
    %32 = arith.mulf %31, %19 : vector<1x128xf32>
    %c0_7 = arith.constant 0 : index
    %c0_8 = arith.constant 0 : index
    %33 = vector.load %arg2[%c0_7, %c0_8] : memref<8x1xf32, #tpu.memory_space<vmem>>, vector<8x1xf32>
    %34 = vector.broadcast %33 : vector<8x1xf32> to vector<8x128xf32>
    %35 = vector.broadcast %10 : vector<1x128xf32> to vector<8x128xf32>
    %36 = arith.mulf %34, %35 : vector<8x128xf32>
    %37 = math.sin %36 : vector<8x128xf32>
    %38 = vector.broadcast %32 : vector<1x128xf32> to vector<8x128xf32>
    %39 = arith.mulf %38, %37 : vector<8x128xf32>
    %c0_9 = arith.constant 0 : index
    %c0_10 = arith.constant 0 : index
    %40 = vector.load %arg3[%c0_9, %c0_10] : memref<8x128xf32, #tpu.memory_space<vmem>>, vector<8x128xf32>
    tpu.vector_store %arg3[%c0_9, %c0_10], %39 {strides = array<i32>} : memref<8x128xf32, #tpu.memory_space<vmem>>, vector<8x128xf32>,
    return
  }
  func.func @transform_0(%arg0: i32) -> (i32, i32) {
    %c0_i32 = arith.constant 0 : i32
    %c0_i32_0 = arith.constant 0 : i32
    return %c0_i32, %arg0 : i32, i32
  }
  func.func @transform_1(%arg0: i32) -> (i32, i32) {
    %c0_i32 = arith.constant 0 : i32
    %c0_i32_0 = arith.constant 0 : i32
    %c0_i32_1 = arith.constant 0 : i32
    return %c0_i32, %c0_i32_0 : i32, i32
  }
  func.func @transform_2(%arg0: i32) -> (i32, i32) {
    %c0_i32 = arith.constant 0 : i32
    %c0_i32_0 = arith.constant 0 : i32
    return %c0_i32, %arg0 : i32, i32
  }
}

</mosaic_0001>

<bundles_post_ra>
// kernel: tpu_custom_call.1
= control target key start
LH: loop header
LB: loop body
LE: loop exit
PB: predicated region body
PF: predicated region fallthrough
CT: control target
= control target key end

     0   :  { %v222_v1 = vmov 0   ;;  %s303_s0 = inlined_call_operand.vmem [shape: f32[1,64], index: 0, kind: input, shape index: {}]   ;;  %s304_s1 = inlined_call_operand.vmem [shape: f32[8,1], index: 1, kind: input, shape index: {}]   ;;  %s305_s2 = inlined_call_operand.hbm [shape: f32[8,64], index: 2, kind: output, shape index: {}]  }
   0x1   :  { %v38_v0 = vld [vmem:[%s304_s1] sm:$0xff]  ;;  %191 = vset.pattern.permute.xlu0 %v222_v1 }
   0x2   :  { %41 = vperm.xlu0 %191, %v38_v0  }
   0x3   :  { %7 = vsyncpa [#allocation3], 0  ;;  %v12_v2 = vlaneseq  ;;  %v18_v4 = vld [vmem:[%s303_s0] sm:$0x1]  ;;  %v223_v22 = vmov 683565275  }
   0x4   :  { %v224_v24 = vmov 2475754826   ;;  %v225_v27 = vmov 2131351028   ;;  %v226_v30 = vmov 2102212464  }
   0x5   :  { %v13_v3 = vand.u32 127, %v12_v2  ;;  %v252_v5 = vshrl.u32 %v12_v2, 7  ;;  %v227_v33 = vmov 920167782   ;;  %v228_v36 = vmov 1326507024  }
   0x6   :  { %s230_s0 = smov [#allocation2]  }
   0x7   :  { %vm17_vm0 = vcmp.lt.s32.totalorder %v13_v3, 64  ;;  %v46_v8 = vsub.s32 0, %v252_v5  ;;  %s165_s1 = sshll.u32 %s230_s0, 4  ;;  %s166_s1 = int_to_ptr.vmem [resolvable:$true] %s165_s1 }
   0x8   :  { %v19_v6 = vsel %vm17_vm0, %v18_v4, 5.0  ;;  %s198_s13 = scalar_lea.vmem %s166_s1, 128  ;;  %p203_p1 = scmp.lt.s32.totalorder %s166_s1, %s166_s1 }
   0x9   :  { %v254_v7 = vmul.f32 0.2, %v19_v6  ;;  %p199_p0 = scmp.ne.s32.totalorder %s166_s1, %s198_s13  ;;  %p204_p2 = scmp.lt.s32.totalorder %s198_s13, %s198_s13 }
   0xb   :  { %v47_v9 = vrot.slane %v254_v7, %v46_v8  ;;  %192 = vrcp.f32 %v254_v7  ;;  %vm25_vm10 = vcmp.lt.f32.partialorder %v254_v7, 1.0  ;;  %p205_p3 = por %p204_p2, %p203_p1 }
   0xd   :  { %p206_p4 = pnand %p205_p3, %p199_p0 }
  0x81   :  { %v42_v10 = vpop.permute.xlu0 %41 }
  0x82   :  { %v260_v11 = vmul.f32 %v47_v9, %v42_v10 }
  0x84   :  { %v52_v12 = vand.u32 2139095040, %v260_v11  ;;  %v49_v16 = vand.u32 2147483647, %v260_v11  ;;  %vm51_vm8 = vcmp.lt.s32.totalorder %v260_v11, 0  ;;  %vm141_vm14 = vweird.f32 %v260_v11 }
  0x86   :  { %v53_v13 = vshrl.u32 %v52_v12, 23  ;;  %v56_v19 = vand.u32 8388607, %v49_v16  ;;  %vm50_vm9 = vcmp.le.f32.partialorder %v49_v16, 0.7853982 }
  0x88   :  { %v174_v14 = vadd.s32 4294967169, %v53_v13  ;;  %v57_v38 = vor.u32 8388608, %v56_v19  ;;  %v31_v19 = vmul.f32 -21.0, %v254_v7 }
  0x8a   :  { %v59_v15 = vadd.s32 1, %v174_v14  ;;  %v97_v52 = vshll.u32 %v57_v38, 8 }
  0x8c   :  { %vm60_vm1 = vcmp.gt.s32.totalorder %v59_v15, 0 }
  0x8d   :  { %v61_v17 = vsel %vm60_vm1, %v59_v15, 0 }
  0x8e   :  { %v63_v18 = vand.u32 31, %v61_v17  ;;  %v62_v21 = vshrl.u32 %v61_v17, 5 }
  0x90   :  { %v64_v20 = vsub.s32 32, %v63_v18  ;;  %v66_v23 = vshll.u32 %v223_v22, %v63_v18  ;;  %v69_v25 = vshll.u32 %v224_v24, %v63_v18  ;;  %v72_v29 = vshll.u32 %v225_v27, %v63_v18 }
  0x91   :  { %v75_v32 = vshll.u32 %v226_v30, %v63_v18  ;;  %v78_v35 = vshll.u32 %v227_v33, %v63_v18  ;;  %vm81_vm2 = vcmp.lt.s32.totalorder %v62_v21, 1  ;;  %vm84_vm3 = vcmp.lt.s32.totalorder %v62_v21, 4 }
  0x92   :  { %v67_v26 = vshrl.u32 %v224_v24, %v64_v20  ;;  %v70_v28 = vshrl.u32 %v225_v27, %v64_v20  ;;  %v73_v31 = vshrl.u32 %v226_v30, %v64_v20  ;;  %v76_v34 = vshrl.u32 %v227_v33, %v64_v20  ;;  %v193_v27 = vpop.eup %192 }
  0x93   :  { %v79_v37 = vshrl.u32 %v228_v36, %v64_v20  ;;  %v65_v47 = vshrl.u32 %v223_v22, %v64_v20  ;;  %vm83_vm4 = vcmp.lt.s32.totalorder %v62_v21, 3  ;;  %vm82_vm5 = vcmp.lt.s32.totalorder %v62_v21, 2 }
  0x94   :  { %v68_v39 = vor.u32 %v67_v26, %v66_v23  ;;  %v71_v40 = vor.u32 %v70_v28, %v69_v25  ;;  %v74_v41 = vor.u32 %v73_v31, %v72_v29  ;;  %v77_v42 = vor.u32 %v76_v34, %v75_v32 }
  0x95   :  { %v80_v43 = vor.u32 %v79_v37, %v78_v35  ;;  %v28_v25 = vmul.f32 %v254_v7, %v254_v7  ;;  %v32_v26 = vadd.f32 48.0, %v31_v19  ;;  %v22_v31 = vmul.f32 %v193_v27, %v254_v7 }
  0x96   :  { %v86_v44 = vsel %vm84_vm3, %v74_v41, 2102212464  ;;  %v89_v45 = vsel %vm81_vm2, %v68_v39, %v71_v40  ;;  %v93_v46 = vsel %vm81_vm2, %v71_v40, %v74_v41  ;;  %v90_v48 = vsel %vm84_vm3, %v77_v42, 920167782 }
  0x97   :  { %v94_v49 = vsel %vm84_vm3, %v80_v43, 1326507024  ;;  %v91_v50 = vsel %vm83_vm4, %v74_v41, %v90_v48  ;;  %v85_v53 = vsel %vm81_vm2, %v65_v47, %v68_v39  ;;  %v87_v54 = vsel %vm83_vm4, %v71_v40, %v86_v44 }
  0x98   :  { %v95_v51 = vsel %vm83_vm4, %v77_v42, %v94_v49  ;;  %v92_v55 = vsel %vm82_vm5, %v89_v45, %v91_v50  ;;  %v88_v61 = vsel %vm82_vm5, %v85_v53, %v87_v54  ;;  %v29_v32 = vmul.f32 %v28_v25, %v28_v25 }
  0x99   :  { %v96_v56 = vsel %vm82_vm5, %v93_v46, %v95_v51  ;;  %v269_v59 = vmul.u32.u64.low %v97_v52, %v92_v55  ;;  %v270_v60 = vmul.u32.u64.high %v97_v52, %v92_v55, %v269_v59  ;;  %v104_v63 = vmul.u32 %v97_v52, %v88_v61 }
  0x9a   :  { %v266_v57 = vmul.u32.u64.low %v97_v52, %v96_v56  ;;  %v267_v58 = vmul.u32.u64.high %v97_v52, %v96_v56, %v266_v57  ;;  %v33_v33 = vmul.f32 %v32_v26, %v254_v7  ;;  %v23_v37 = vsub.f32 2.0, %v22_v31 }
  0x9b   :  { %v107_v62 = vadd.s32 1, %v270_v60  ;;  %v30_v38 = vmul.f32 %v29_v32, %v254_v7  ;;  %v229_v48 = vmov 0.0  }
  0x9c   :  { %vm106_vm6 = vc.u32 %v267_v58, %v269_v59  ;;  %v105_v15 = vadd.s32 %v269_v59, %v267_v58  ;;  %v34_v39 = vadd.f32 -28.0, %v33_v33  ;;  %v24_v43 = vmul.f32 %v193_v27, %v23_v37 }
  0x9d   :  { %v108_v0 = vsel %vm106_vm6, %v107_v62, %v270_v60  ;;  %v173_v49 = vsel %vm25_vm10, 1.0, %v229_v48 }
  0x9e   :  { %v109_v1 = vadd.s32 %v108_v0, %v104_v63  ;;  %v35_v44 = vmul.f32 %v34_v39, %v30_v38 }
  0xa0   :  { %v110_v2 = vadd.s32 536870912, %v109_v1  ;;  %v36_v47 = vadd.f32 %v35_v44, %v24_v43 }
  0xa2   :  { %v111_v3 = vshrl.u32 %v110_v2, 30  ;;  %v37_v51 = vmul.f32 %v173_v49, %v36_v47 }
  0xa4   :  { %v112_v4 = vshll.u32 %v111_v3, 30  ;;  %v135_v35 = vsub.s32 4, %v111_v3  ;;  %v156_v56 = vrot.slane %v37_v51, %v46_v8 }
  0xa6   :  { %v113_v6 = vsub.s32 %v109_v1, %v112_v4  ;;  %v136_v41 = vsel %vm51_vm8, %v135_v35, %v111_v3 }
  0xa7   :  { %v138_v45 = vsel %vm50_vm9, 0, %v136_v41 }
  0xa8   :  { %v115_v9 = vsub.s32 0, %v113_v6  ;;  %v142_v46 = vadd.s32 3, %v138_v45 }
  0xaa   :  { %v175_v10 = vmin.u32 %v115_v9, %v113_v6  ;;  %v143_v50 = vand.u32 3, %v142_v46 }
  0xac   :  { %v117_v12 = vclz %v175_v10  ;;  %vm148_vm11 = vcmp.eq.s32.totalorder %v143_v50, 2  ;;  %vm145_vm12 = vcmp.eq.s32.totalorder %v143_v50, 0  ;;  %vm144_vm13 = vcmp.lt.s32.totalorder %v143_v50, 2 }
  0xae   :  { %v176_v13 = vadd.s32 4294967294, %v117_v12 }
  0xb0   :  { %vm177_vm7 = vcmp.lt.s32.totalorder %v176_v13, 0 }
  0xb1   :  { %v120_v14 = vsel %vm177_vm7, 0, %v176_v13 }
  0xb2   :  { %v121_v17 = vsub.s32 32, %v120_v14  ;;  %v125_v18 = vsub.s32 4294967266, %v120_v14  ;;  %v122_v20 = vshll.u32 %v113_v6, %v120_v14 }
  0xb4   :  { %v123_v21 = vshrl.u32 %v105_v15, %v121_v17  ;;  %v126_v22 = vadd.s32 127, %v125_v18 }
  0xb6   :  { %v124_v23 = vor.u32 %v123_v21, %v122_v20  ;;  %v127_v24 = vshll.u32 %v126_v22, 23 }
  0xb8   :  { %v128_v28 = vor.u32 4788187, %v127_v24  ;;  %v131_v30 = vcvt.s32.f32 %v124_v23 }
  0xba   :  { %v129_v29 = vand.u32 2147483647, %v128_v28 }
  0xbc   :  { %v132_v34 = vmul.f32 %v131_v30, %v129_v29 }
  0xbe   :  { %v133_v36 = vxor.u32 2147483648, %v132_v34 }
  0xc0   :  { %v134_v40 = vsel %vm51_vm8, %v133_v36, %v132_v34 }
  0xc1   :  { %v137_v42 = vsel %vm50_vm9, %v260_v11, %v134_v40 }
  0xc2   :  { %194 = vcosq.f32 %v137_v42 }
  0xc3   :  { %196 = vsinq.f32 %v137_v42 }
  0xcc   :  { %v195_v52 = vpop.eup %194 }
  0xcd   :  { %v197_v53 = vpop.eup %196  ;;  %v149_v54 = vxor.u32 2147483648, %v195_v52 }
  0xce   :  { %v146_v16 = vxor.u32 2147483648, %v197_v53 }
  0xcf   :  { %v150_v55 = vsel %vm148_vm11, %v149_v54, %v197_v53 }
  0xd0   :  { %v147_v57 = vsel %vm145_vm12, %v195_v52, %v146_v16 }
  0xd1   :  { %v151_v7 = vsel %vm144_vm13, %v147_v57, %v150_v55 }
  0xd2   :  { %v152_v58 = vsel %vm141_vm14, nan, %v151_v7 }
  0xd3   :  { %v157_v59 = vmul.f32 %v156_v56, %v152_v58 }
  0xd5   :  { %158 = vst [vmem:[#allocation2] sm:$0xff] %v157_v59 }
  0xd6   :  { %209 = shalt.err (!%p206_p4)
}
  0xd7   :  { %s210_s16 = scalar_lea.hbm %s305_s2, 128 }
  0xd8   :  { %p211_p5 = scmp.ne.s32.totalorder %s305_s2, %s210_s16  ;;  %p214_p6 = scmp.lt.u32.totalorder %s210_s16, %s305_s2 }
  0xda   :  { %p216_p7 = pnand %p214_p6, %p211_p5 }
  0xdc   :  { %219 = shalt.err (!%p216_p7)
}
  0xdd   :  { %168 = dma.vmem_to_hbm [thread:$0]  %s166_s1, 128, %s305_s2, [#allocation3]  }
  0xde   :  { %220 = dma.done.wait [#allocation3], 128  }
  0xdf   :  { %221 = vsyncadd [#allocation3], 4294967168 }
  0xe0   :  { %172 = vsyncpa [#allocation3], 1 }

</bundles_post_ra>
